<compile_context>
chip_gen: v5e
topology: v5e:2x2
jax: 0.10.0
libtpu: 0.0.40
codegen_flags: <defaults>
</compile_context>

<pallas_src>
import functools

import jax
import jax.numpy as jnp
from jax.experimental import pallas as pl
from jax.experimental.pallas import tpu as pltpu


def _round_up(x, m):
    return ((x + m - 1) // m) * m


def _act_dtype():
    """bf16 elementwise/tanh only on parts with a bf16 VPU/EUP (v6e, v7x)."""
    try:
        kind = jax.devices()[0].device_kind.lower()
    except Exception:
        return jnp.float32
    if "v6" in kind or "v7" in kind:
        return jnp.bfloat16
    return jnp.float32


def _pick_batch_tile(B, batch_tile):
    batch_tile = max(8, _round_up(batch_tile, 8))
    B8 = _round_up(B, 8)
    if B8 <= batch_tile:
        return B8
    # Batch needs several tiles: make sure there are at least 2 (ideally even)
    # so a dual-TensorCore part (v7x) can split the "parallel" grid axis.
    half = _round_up(-(-B8 // 2), 128)
    return max(8, min(batch_tile, half))


def _cake_kernel(x_ref, w0_ref, b0_ref, w1_ref, b1_ref, w2_ref, b2_ref,
                 o_ref, *, act_dtype):
    # x: (TB, K) bf16 -- already sigmoid(d)*(sigmoid(u)-sigmoid(i)) from wrapper.
    x = x_ref[...]

    # layer 0: MXU (TB,K)@(K,512), f32 accumulate; folded weights -> just tanh.
    z = jnp.dot(x, w0_ref[...], preferred_element_type=jnp.float32) + b0_ref[...]
    t1 = jnp.tanh(z.astype(act_dtype))                      # (TB, 512)
    # dropout_layer1: identity in eval mode

    # layer 1: MXU (TB,512)@(512,256), f32 accumulate.
    z = jnp.dot(t1.astype(jnp.bfloat16), w1_ref[...],
                preferred_element_type=jnp.float32) + b1_ref[...]
    t2 = jnp.tanh(z.astype(act_dtype))                      # (TB, 256)
    # dropout_layer2: identity in eval mode

    # layer 2 (256 -> 1): VPU multiply + lane reduction, keepdims -> (TB, 1).
    y = jnp.sum(t2.astype(jnp.float32) * w2_ref[...], axis=-1,
                keepdims=True) + b2_ref[...]                # (TB, 1)
    # Final activation keeps the explicit sigmoid (only inner ones are folded).
    o_ref[...] = 0.5 * jnp.tanh(y) + 0.5


def cake_forward(params, user_ids, item_ids, *, batch_tile=2048):
    # --- static weight prep (hoisted: weights are fixed at inference) ---
    # MonotonicLinear transform 2*relu(-W)+W == |W|, plus sigmoid affine fold.
    w0 = jnp.abs(params["w0"])                      # (K,  N1)
    w1 = jnp.abs(params["w1"])                      # (N1, N2)
    w2 = jnp.abs(params["w2"]).reshape(1, -1)       # (1,  N2)
    b0 = params["b0"].reshape(1, -1).astype(jnp.float32)
    b1 = params["b1"].reshape(1, -1).astype(jnp.float32)
    b2 = params["b2"].reshape(1, 1).astype(jnp.float32)

    K, N1 = w0.shape
    N2 = w1.shape[1]

    w0f = (0.5 * w0).astype(jnp.bfloat16)                                   # (K, N1)
    b0f = (0.5 * b0).astype(jnp.float32)                                    # (1, N1)
    w1f = (0.25 * w1).astype(jnp.bfloat16)                                  # (N1, N2)
    b1f = (0.5 * b1 + 0.25 * jnp.sum(w1, axis=0, keepdims=True)).astype(jnp.float32)
    w2f = (0.25 * w2).astype(jnp.float32)                                   # (1, N2)
    b2f = (0.5 * b2 + 0.25 * jnp.sum(w2)).astype(jnp.float32)               # (1, 1)

    # --- glue: embedding gathers + input sigmoids (static math, tiny vs MLP) ---
    # TODO(synk): fuse gather into the kernel with VMEM-resident tables +
    # PrefetchScalarGridSpec ids (do NOT use a per-row pl.Element grid).
    u = jax.nn.sigmoid(params["user_emb"][user_ids])        # (B, K) f32
    it = jax.nn.sigmoid(params["item_emb"][item_ids])       # (B, K) f32
    d = jax.nn.sigmoid(params["disc_emb"][item_ids])        # (B, 1) f32
    x = (d * (u - it)).astype(jnp.bfloat16)                 # (B, K) bf16

    B = user_ids.shape[0]
    TB = _pick_batch_tile(B, batch_tile)
    B_pad = _round_up(B, TB)
    if B_pad != B:
        x = jnp.pad(x, ((0, B_pad - B), (0, 0)))
    num_tiles = B_pad // TB

    act_dtype = _act_dtype()
    kernel = functools.partial(_cake_kernel, act_dtype=act_dtype)

    flops = 2 * B_pad * (K * N1 + N1 * N2 + N2)
    transcendentals = B_pad * (N1 + N2 + 1)
    bytes_accessed = (B_pad * K * 2 + B_pad * 4
                      + (K * N1 + N1 * N2) * 2
                      + (N1 + N2 + N2 + 1) * 4)

    out = pl.pallas_call(
        kernel,
        out_shape=jax.ShapeDtypeStruct((B_pad, 1), jnp.float32),
        grid=(num_tiles,),
        in_specs=[
            pl.BlockSpec((TB, K), lambda i: (i, 0)),    # fused input tile
            pl.BlockSpec((K, N1), lambda i: (0, 0)),    # 0.5*|W0|   (VMEM-resident)
            pl.BlockSpec((1, N1), lambda i: (0, 0)),    # 0.5*b0
            pl.BlockSpec((N1, N2), lambda i: (0, 0)),   # 0.25*|W1|  (VMEM-resident)
            pl.BlockSpec((1, N2), lambda i: (0, 0)),    # folded b1
            pl.BlockSpec((1, N2), lambda i: (0, 0)),    # 0.25*|W2| row
            pl.BlockSpec((1, 1), lambda i: (0, 0)),     # folded b2
        ],
        out_specs=pl.BlockSpec((TB, 1), lambda i: (i, 0)),
        compiler_params=pltpu.CompilerParams(
            dimension_semantics=("parallel",),
            vmem_limit_bytes=32 * 1024 * 1024,
        ),
        cost_estimate=pl.CostEstimate(
            flops=flops,
            transcendentals=transcendentals,
            bytes_accessed=bytes_accessed,
        ),
    )(x, w0f, b0f, w1f, b1f, w2f, b2f)

    return out.reshape(-1)[:B]                       # output.view(-1)


# --------------------------- reference & init ---------------------------

def _reference_forward(params, user_ids, item_ids):
    """Pure-JAX f32 reference matching the PyTorch module exactly."""
    def mono(w):  # MonotonicLinear: 2*relu(-W)+W  (weights stored as (in, out))
        return 2.0 * jax.nn.relu(-w) + w
    u = jax.nn.sigmoid(params["user_emb"][user_ids])
    it = jax.nn.sigmoid(params["item_emb"][item_ids])
    d = jax.nn.sigmoid(params["disc_emb"][item_ids])
    x = d * (u - it)
    h = jax.nn.sigmoid(x @ mono(params["w0"]) + params["b0"])
    h = jax.nn.sigmoid(h @ mono(params["w1"]) + params["b1"])
    y = jax.nn.sigmoid(h @ mono(params["w2"]) + params["b2"])
    return y.reshape(-1)


def xavier_normal(key, shape):
    # shape = (fan_out, fan_in) like torch nn.Linear / nn.Embedding weight
    fan_out, fan_in = shape
    std = jnp.sqrt(2.0 / (fan_in + fan_out))
    return std * jax.random.normal(key, shape, dtype=jnp.float32)


def init_params(key, user_n, item_n, knowledge_dim):
    n1, n2 = 512, 256
    ks = jax.random.split(key, 9)
    user_emb = xavier_normal(ks[0], (user_n, knowledge_dim))
    item_emb = xavier_normal(ks[1], (item_n, knowledge_dim))
    disc_emb = xavier_normal(ks[2], (item_n, 1))
    # linear weights, stored signed and pre-transposed as (in, out)
    w0 = xavier_normal(ks[3], (n1, knowledge_dim)).T      # (K, 512)
    w1 = xavier_normal(ks[4], (n2, n1)).T                 # (512, 256)
    w2 = xavier_normal(ks[5], (1, n2)).T                  # (256, 1)
    b0 = jax.random.uniform(ks[6], (1, n1), jnp.float32, -0.01, 0.01)
    b1 = jax.random.uniform(ks[7], (1, n2), jnp.float32, -0.01, 0.01)
    b2 = jax.random.uniform(ks[8], (1, 1), jnp.float32, -0.01, 0.01)
    return dict(user_emb=user_emb, item_emb=item_emb, disc_emb=disc_emb,
                w0=w0, b0=b0, w1=w1, b1=b1, w2=w2, b2=b2)


if __name__ == "__main__":
    key = jax.random.PRNGKey(0)
    USER_N, ITEM_N, K, B = 10, 12, 32, 8

    pkey, ukey, ikey = jax.random.split(key, 3)
    params = init_params(pkey, USER_N, ITEM_N, K)

    user_ids = jax.random.randint(ukey, (B,), 0, USER_N, dtype=jnp.int32)
    item_ids = jax.random.randint(ikey, (B,), 0, ITEM_N, dtype=jnp.int32)

    out = jax.jit(cake_forward)(params, user_ids, item_ids)
    out = jax.block_until_ready(out)

    ref = _reference_forward(params, user_ids, item_ids)

    assert out.shape == (B,)
    assert jnp.all(jnp.isfinite(out))
    assert jnp.all((out >= 0.0) & (out <= 1.0))
    assert float(jnp.max(jnp.abs(out - ref))) < 2e-2, "mismatch vs f32 reference"
    print("KERNEL_OK")
</pallas_src>

<mosaic_0001>
module attributes {stable_mosaic.version = 11 : i64} {
  func.func @_cake_kernel(%arg0: i32, %arg1: memref<8x32xbf16, #tpu.memory_space<vmem>>, %arg2: memref<32x512xbf16, #tpu.memory_space<vmem>>, %arg3: memref<1x512xf32, #tpu.memory_space<vmem>>, %arg4: memref<512x256xbf16, #tpu.memory_space<vmem>>, %arg5: memref<1x256xf32, #tpu.memory_space<vmem>>, %arg6: memref<1x256xf32, #tpu.memory_space<vmem>>, %arg7: memref<1x1xf32, #tpu.memory_space<vmem>>, %arg8: memref<8x1xf32, #tpu.memory_space<vmem>>) attributes {dimension_semantics = [#tpu.dimension_semantics<parallel>], iteration_bounds = array<i64: 1>, scalar_prefetch = 0 : i64, scratch_operands = 0 : i64, tpu.core_type = #tpu.core_type<tc>, window_params = [{transform_indices = @transform_0, window_bounds = array<i64: 8, 32>}, {pipeline_mode = #tpu.pipeline_mode<synchronous>, transform_indices = @transform_1, window_bounds = array<i64: 32, 512>}, {pipeline_mode = #tpu.pipeline_mode<synchronous>, transform_indices = @transform_2, window_bounds = array<i64: 1, 512>}, {pipeline_mode = #tpu.pipeline_mode<synchronous>, transform_indices = @transform_3, window_bounds = array<i64: 512, 256>}, {pipeline_mode = #tpu.pipeline_mode<synchronous>, transform_indices = @transform_4, window_bounds = array<i64: 1, 256>}, {pipeline_mode = #tpu.pipeline_mode<synchronous>, transform_indices = @transform_5, window_bounds = array<i64: 1, 256>}, {pipeline_mode = #tpu.pipeline_mode<synchronous>, transform_indices = @transform_6, window_bounds = array<i64: 1, 1>}, {transform_indices = @transform_7, window_bounds = array<i64: 8, 1>}]} {
    %c0 = arith.constant 0 : index
    %c0_0 = arith.constant 0 : index
    %0 = vector.load %arg1[%c0, %c0_0] : memref<8x32xbf16, #tpu.memory_space<vmem>>, vector<8x32xbf16>
    %c0_1 = arith.constant 0 : index
    %c0_2 = arith.constant 0 : index
    %1 = vector.load %arg2[%c0_1, %c0_2] : memref<32x512xbf16, #tpu.memory_space<vmem>>, vector<32x512xbf16>
    %cst = arith.constant dense<0.000000e+00> : vector<8x512xf32>
    %2 = tpu.matmul %0, %1, %cst {dimension_numbers = #tpu.dot_dimension_numbers<[1], [0], [0], [1], [0, 0, 1, 1], [], []>} : vector<8x32xbf16>, vector<32x512xbf16>, vector<8x512xf32> -> vector<8x512xf32>
    %c0_3 = arith.constant 0 : index
    %c0_4 = arith.constant 0 : index
    %3 = vector.load %arg3[%c0_3, %c0_4] : memref<1x512xf32, #tpu.memory_space<vmem>>, vector<1x512xf32>
    %4 = vector.broadcast %3 : vector<1x512xf32> to vector<8x512xf32>
    %5 = arith.addf %2, %4 : vector<8x512xf32>
    %6 = math.tanh %5 : vector<8x512xf32>
    %7 = arith.truncf %6 : vector<8x512xf32> to vector<8x512xbf16>
    %c0_5 = arith.constant 0 : index
    %c0_6 = arith.constant 0 : index
    %8 = vector.load %arg4[%c0_5, %c0_6] : memref<512x256xbf16, #tpu.memory_space<vmem>>, vector<512x256xbf16>
    %cst_7 = arith.constant dense<0.000000e+00> : vector<8x256xf32>
    %9 = tpu.matmul %7, %8, %cst_7 {dimension_numbers = #tpu.dot_dimension_numbers<[1], [0], [0], [1], [0, 0, 1, 1], [], []>} : vector<8x512xbf16>, vector<512x256xbf16>, vector<8x256xf32> -> vector<8x256xf32>
    %c0_8 = arith.constant 0 : index
    %c0_9 = arith.constant 0 : index
    %10 = vector.load %arg5[%c0_8, %c0_9] : memref<1x256xf32, #tpu.memory_space<vmem>>, vector<1x256xf32>
    %11 = vector.broadcast %10 : vector<1x256xf32> to vector<8x256xf32>
    %12 = arith.addf %9, %11 : vector<8x256xf32>
    %13 = math.tanh %12 : vector<8x256xf32>
    %c0_10 = arith.constant 0 : index
    %c0_11 = arith.constant 0 : index
    %14 = vector.load %arg6[%c0_10, %c0_11] : memref<1x256xf32, #tpu.memory_space<vmem>>, vector<1x256xf32>
    %15 = vector.broadcast %14 : vector<1x256xf32> to vector<8x256xf32>
    %16 = arith.mulf %13, %15 : vector<8x256xf32>
    %cst_12 = arith.constant dense<0.000000e+00> : vector<8xf32>
    %17 = vector.multi_reduction <add>, %16, %cst_12 [1] : vector<8x256xf32> to vector<8xf32>
    %18 = vector.shape_cast %17 : vector<8xf32> to vector<8x1xf32>
    %c0_13 = arith.constant 0 : index
    %c0_14 = arith.constant 0 : index
    %19 = vector.load %arg7[%c0_13, %c0_14] : memref<1x1xf32, #tpu.memory_space<vmem>>, vector<1x1xf32>
    %20 = vector.broadcast %19 : vector<1x1xf32> to vector<8x1xf32>
    %21 = arith.addf %18, %20 : vector<8x1xf32>
    %22 = math.tanh %21 : vector<8x1xf32>
    %cst_15 = arith.constant 5.000000e-01 : f32
    %23 = vector.broadcast %cst_15 : f32 to vector<8x1xf32>
    %24 = arith.mulf %23, %22 : vector<8x1xf32>
    %cst_16 = arith.constant 5.000000e-01 : f32
    %25 = vector.broadcast %cst_16 : f32 to vector<8x1xf32>
    %26 = arith.addf %24, %25 : vector<8x1xf32>
    %c0_17 = arith.constant 0 : index
    %c0_18 = arith.constant 0 : index
    %27 = vector.load %arg8[%c0_17, %c0_18] : memref<8x1xf32, #tpu.memory_space<vmem>>, vector<8x1xf32>
    tpu.vector_store %arg8[%c0_17, %c0_18], %26 {strides = array<i32>} : memref<8x1xf32, #tpu.memory_space<vmem>>, vector<8x1xf32>,
    return
  }
  func.func @transform_0(%arg0: i32) -> (i32, i32) {
    %c0_i32 = arith.constant 0 : i32
    %c0_i32_0 = arith.constant 0 : i32
    return %arg0, %c0_i32 : i32, i32
  }
  func.func @transform_1(%arg0: i32) -> (i32, i32) {
    %c0_i32 = arith.constant 0 : i32
    %c0_i32_0 = arith.constant 0 : i32
    %c0_i32_1 = arith.constant 0 : i32
    return %c0_i32, %c0_i32_0 : i32, i32
  }
  func.func @transform_2(%arg0: i32) -> (i32, i32) {
    %c0_i32 = arith.constant 0 : i32
    %c0_i32_0 = arith.constant 0 : i32
    %c0_i32_1 = arith.constant 0 : i32
    return %c0_i32, %c0_i32_0 : i32, i32
  }
  func.func @transform_3(%arg0: i32) -> (i32, i32) {
    %c0_i32 = arith.constant 0 : i32
    %c0_i32_0 = arith.constant 0 : i32
    %c0_i32_1 = arith.constant 0 : i32
    return %c0_i32, %c0_i32_0 : i32, i32
  }
  func.func @transform_4(%arg0: i32) -> (i32, i32) {
    %c0_i32 = arith.constant 0 : i32
    %c0_i32_0 = arith.constant 0 : i32
    %c0_i32_1 = arith.constant 0 : i32
    return %c0_i32, %c0_i32_0 : i32, i32
  }
  func.func @transform_5(%arg0: i32) -> (i32, i32) {
    %c0_i32 = arith.constant 0 : i32
    %c0_i32_0 = arith.constant 0 : i32
    %c0_i32_1 = arith.constant 0 : i32
    return %c0_i32, %c0_i32_0 : i32, i32
  }
  func.func @transform_6(%arg0: i32) -> (i32, i32) {
    %c0_i32 = arith.constant 0 : i32
    %c0_i32_0 = arith.constant 0 : i32
    %c0_i32_1 = arith.constant 0 : i32
    return %c0_i32, %c0_i32_0 : i32, i32
  }
  func.func @transform_7(%arg0: i32) -> (i32, i32) {
    %c0_i32 = arith.constant 0 : i32
    %c0_i32_0 = arith.constant 0 : i32
    return %arg0, %c0_i32 : i32, i32
  }
}

</mosaic_0001>

<bundles_post_ra>
// kernel: cake_forward.1
= control target key start
LH: loop header
LB: loop body
LE: loop exit
PB: predicated region body
PF: predicated region fallthrough
CT: control target
= control target key end

     0   :  { %vm88_vm0 = vcmask 261120   ;;  %vm667_vm1 = vcmask 7168   ;;  %s1546_s1 = inlined_call_operand.vmem [shape: bf16[32,512], index: 1, kind: input, shape index: {}]   ;;  %s1547_s0 = inlined_call_operand.vmem [shape: bf16[8,32], index: 0, kind: input, shape index: {}]   ;;  %s1548_s3 = inlined_call_operand.vmem [shape: bf16[512,256], index: 3, kind: input, shape index: {}]   ;;  %s1549_s2 = inlined_call_operand.vmem [shape: f32[1,512], index: 2, kind: input, shape index: {}]   ;;  %s1550_s4 = inlined_call_operand.vmem [shape: f32[1,256], index: 4, kind: input, shape index: {}]   ;;  %s1551_s6 = inlined_call_operand.<no memory space> [shape: f32[1,1], index: 6, kind: input, shape index: {}]   ;;  %s1552_s5 = inlined_call_operand.vmem [shape: f32[1,256], index: 5, kind: input, shape index: {}]   ;;  %s1553_s7 = inlined_call_operand.vmem [shape: f32[8,1], index: 7, kind: output, shape index: {}]  }
   0x1   :  { %v691_v0 = vld [vmem:[%s1546_s1 + $0x20] sm:$0xf]  ;;  %v971_v1 = vld [vmem:[%s1546_s1 + $0x2c] sm:$0xf0]  ;;  %v969_v2 = vld [vmem:[%s1546_s1 + $0x24] sm:$0xf] }
   0x2   :  { %v692_v3 = vor.u32 %v971_v1, %v691_v0  ;;  %v693_v4 = vld [vmem:[%s1546_s1 + $0x30] sm:$0xf0]  ;;  %v699_v5 = vld [vmem:[%s1546_s1 + $0x28] sm:$0xf]  ;;  %v972_v6 = vld [vmem:[%s1546_s1 + $0x34] sm:$0xf0] }
   0x3   :  { %v696_v7 = vor.u32 %v969_v2, %v693_v4  ;;  %v700_v8 = vor.u32 %v972_v6, %v699_v5  ;;  %v970_v9 = vld [vmem:[%s1546_s1 + $0x2c] sm:$0xf]  ;;  %v701_v10 = vld [vmem:[%s1546_s1 + $0x38] sm:$0xf0]  ;;  %v675_v11 = vld [vmem:[%s1546_s1] sm:$0xf] }
   0x4   :  { %98 = vmatpush.bf16.msra.mxu0 %v692_v3  ;;  %v704_v12 = vor.u32 %v970_v9, %v701_v10  ;;  %v967_v13 = vld [vmem:[%s1546_s1 + $0xc] sm:$0xf0]  ;;  %v965_v14 = vld [vmem:[%s1546_s1 + $0x4] sm:$0xf]  ;;  %v677_v15 = vld [vmem:[%s1546_s1 + $0x10] sm:$0xf0] }
   0x5   :  { %111 = vmatpush.bf16.msra.mxu1 %v696_v7  ;;  %124 = vmatpush.bf16.msra.mxu2 %v700_v8  ;;  %v676_v16 = vor.u32 %v967_v13, %v675_v11  ;;  %v680_v17 = vor.u32 %v965_v14, %v677_v15  ;;  %v683_v18 = vld [vmem:[%s1546_s1 + $0x8] sm:$0xf]  ;;  %v968_v19 = vld [vmem:[%s1546_s1 + $0x14] sm:$0xf0]  ;;  %v966_v20 = vld [vmem:[%s1546_s1 + $0xc] sm:$0xf] }
   0x6   :  { %137 = vmatpush.bf16.msra.mxu3 %v704_v12  ;;  %v684_v21 = vor.u32 %v968_v19, %v683_v18  ;;  %v685_v22 = vld [vmem:[%s1546_s1 + $0x18] sm:$0xf0]  ;;  %v29_v23 = vld [vmem:[%s1547_s0] sm:$0xf]  ;;  %v767_v24 = vld [vmem:[%s1548_s3 + $0x70] sm:$0xf] }
   0x7   :  { %v688_v25 = vor.u32 %v966_v20, %v685_v22  ;;  %v988_v26 = vld [vmem:[%s1548_s3 + $0x74] sm:$0xf0]  ;;  %v831_v27 = vld [vmem:[%s1548_s3 + $0xf0] sm:$0xf]  ;;  %v759_v31 = vld [vmem:[%s1548_s3 + $0x60] sm:$0xf] }
   0x8   :  { %v1004_v28 = vld [vmem:[%s1548_s3 + $0xf4] sm:$0xf0]  ;;  %99 = vmatpush.bf16.msra.mxu0 %v676_v16  ;;  %v768_v29 = vor.u32 %v988_v26, %v767_v24  ;;  %v986_v32 = vld [vmem:[%s1548_s3 + $0x64] sm:$0xf0]  ;;  %v823_v33 = vld [vmem:[%s1548_s3 + $0xe0] sm:$0xf] }
   0x9   :  { %v832_v30 = vor.u32 %v1004_v28, %v831_v27  ;;  %112 = vmatpush.bf16.msra.mxu1 %v680_v17  ;;  %125 = vmatpush.bf16.msra.mxu2 %v684_v21  ;;  %v1002_v34 = vld [vmem:[%s1548_s3 + $0xe4] sm:$0xf0]  ;;  %v895_v35 = vld [vmem:[%s1548_s3 + $0x170] sm:$0xf]  ;;  %v1020_v36 = vld [vmem:[%s1548_s3 + $0x174] sm:$0xf0]  ;;  %v760_v37 = vor.u32 %v986_v32, %v759_v31 }
   0xa   :  { %138 = vmatpush.bf16.msra.mxu3 %v688_v25  ;;  %v896_v38 = vor.u32 %v1020_v36, %v895_v35  ;;  %v959_v39 = vld [vmem:[%s1548_s3 + $0x1f0] sm:$0xf]  ;;  %v1036_v40 = vld [vmem:[%s1548_s3 + $0x1f4] sm:$0xf0]  ;;  %v824_v42 = vor.u32 %v1002_v34, %v823_v33  ;;  %v887_v47 = vld [vmem:[%s1548_s3 + $0x160] sm:$0xf] }
   0xb   :  { %v751_v41 = vld [vmem:[%s1548_s3 + $0x50] sm:$0xf]  ;;  %705 = vmatmul.msk.bf16.vlgmr.msra.gmra.mxu0 %vm88_vm0, %v29_v23  ;;  %v960_v43 = vor.u32 %v1036_v40, %v959_v39  ;;  %v984_v44 = vld [vmem:[%s1548_s3 + $0x54] sm:$0xf0]  ;;  %v1018_v48 = vld [vmem:[%s1548_s3 + $0x164] sm:$0xf0] }
   0xc   :  { %542 = vmatpush.bf16.msrb.mxu0 %v768_v29  ;;  %v815_v45 = vld [vmem:[%s1548_s3 + $0xd0] sm:$0xf]  ;;  %v1000_v46 = vld [vmem:[%s1548_s3 + $0xd4] sm:$0xf0]  ;;  %706 = vmatmul.msk.bf16.vlgmr.msra.gmra.mxu1 %vm88_vm0, %v29_v23  ;;  %v951_v49 = vld [vmem:[%s1548_s3 + $0x1e0] sm:$0xf]  ;;  %v888_v50 = vor.u32 %v1018_v48, %v887_v47  ;;  %v752_v52 = vor.u32 %v984_v44, %v751_v41 }
   0xd   :  { %555 = vmatpush.bf16.msrb.mxu1 %v832_v30  ;;  %707 = vmatmul.msk.bf16.vlgmr.msra.gmra.mxu2 %vm88_vm0, %v29_v23  ;;  %v1034_v51 = vld [vmem:[%s1548_s3 + $0x1e4] sm:$0xf0]  ;;  %v743_v54 = vld [vmem:[%s1548_s3 + $0x40] sm:$0xf]  ;;  %v879_v56 = vld [vmem:[%s1548_s3 + $0x150] sm:$0xf]  ;;  %v816_v57 = vor.u32 %v1000_v46, %v815_v45 }
   0xe   :  { %708 = vmatmul.msk.bf16.vlgmr.msra.gmra.mxu3 %vm88_vm0, %v29_v23  ;;  %568 = vmatpush.bf16.msrb.mxu2 %v896_v38  ;;  %v952_v53 = vor.u32 %v1034_v51, %v951_v49  ;;  %v982_v55 = vld [vmem:[%s1548_s3 + $0x44] sm:$0xf0]  ;;  %v1016_v58 = vld [vmem:[%s1548_s3 + $0x154] sm:$0xf0]  ;;  %v943_v59 = vld [vmem:[%s1548_s3 + $0x1d0] sm:$0xf] }
   0xf   :  { %581 = vmatpush.bf16.msrb.mxu3 %v960_v43  ;;  %v1032_v60 = vld [vmem:[%s1548_s3 + $0x1d4] sm:$0xf0]  ;;  %v807_v61 = vld [vmem:[%s1548_s3 + $0xc0] sm:$0xf]  ;;  %v998_v62 = vld [vmem:[%s1548_s3 + $0xc4] sm:$0xf0]  ;;  %v880_v63 = vor.u32 %v1016_v58, %v879_v56  ;;  %v744_v0 = vor.u32 %v982_v55, %v743_v54 }
  0x10   :  { %543 = vmatpush.bf16.msrb.mxu0 %v760_v37  ;;  %v944_v1 = vor.u32 %v1032_v60, %v943_v59  ;;  %v735_v2 = vld [vmem:[%s1548_s3 + $0x30] sm:$0xf]  ;;  %v871_v3 = vld [vmem:[%s1548_s3 + $0x140] sm:$0xf]  ;;  %v1014_v4 = vld [vmem:[%s1548_s3 + $0x144] sm:$0xf0]  ;;  %v808_v5 = vor.u32 %v998_v62, %v807_v61 }
  0x11   :  { %556 = vmatpush.bf16.msrb.mxu1 %v824_v42  ;;  %v980_v6 = vld [vmem:[%s1548_s3 + $0x34] sm:$0xf0]  ;;  %v935_v7 = vld [vmem:[%s1548_s3 + $0x1c0] sm:$0xf]  ;;  %v1030_v8 = vld [vmem:[%s1548_s3 + $0x1c4] sm:$0xf0]  ;;  %v872_v11 = vor.u32 %v1014_v4, %v871_v3 }
  0x12   :  { %569 = vmatpush.bf16.msrb.mxu2 %v888_v50  ;;  %v799_v9 = vld [vmem:[%s1548_s3 + $0xb0] sm:$0xf]  ;;  %v996_v10 = vld [vmem:[%s1548_s3 + $0xb4] sm:$0xf0]  ;;  %v736_v12 = vor.u32 %v980_v6, %v735_v2  ;;  %v936_v13 = vor.u32 %v1030_v8, %v935_v7  ;;  %v727_v14 = vld [vmem:[%s1548_s3 + $0x20] sm:$0xf] }
  0x13   :  { %582 = vmatpush.bf16.msrb.mxu3 %v952_v53  ;;  %v863_v15 = vld [vmem:[%s1548_s3 + $0x130] sm:$0xf]  ;;  %v1012_v16 = vld [vmem:[%s1548_s3 + $0x134] sm:$0xf0]  ;;  %v800_v17 = vor.u32 %v996_v10, %v799_v9  ;;  %v978_v18 = vld [vmem:[%s1548_s3 + $0x24] sm:$0xf0] }
  0x14   :  { %544 = vmatpush.bf16.msrb.mxu0 %v752_v52  ;;  %v927_v19 = vld [vmem:[%s1548_s3 + $0x1b0] sm:$0xf]  ;;  %v1028_v20 = vld [vmem:[%s1548_s3 + $0x1b4] sm:$0xf0]  ;;  %v791_v21 = vld [vmem:[%s1548_s3 + $0xa0] sm:$0xf]  ;;  %v864_v23 = vor.u32 %v1012_v16, %v863_v15  ;;  %v728_v24 = vor.u32 %v978_v18, %v727_v14 }
  0x15   :  { %557 = vmatpush.bf16.msrb.mxu1 %v816_v57  ;;  %v994_v22 = vld [vmem:[%s1548_s3 + $0xa4] sm:$0xf0]  ;;  %v928_v25 = vor.u32 %v1028_v20, %v927_v19  ;;  %v719_v26 = vld [vmem:[%s1548_s3 + $0x10] sm:$0xf]  ;;  %v855_v27 = vld [vmem:[%s1548_s3 + $0x120] sm:$0xf] }
  0x16   :  { %570 = vmatpush.bf16.msrb.mxu2 %v880_v63  ;;  %v1010_v28 = vld [vmem:[%s1548_s3 + $0x124] sm:$0xf0]  ;;  %v792_v29 = vor.u32 %v994_v22, %v791_v21  ;;  %v976_v30 = vld [vmem:[%s1548_s3 + $0x14] sm:$0xf0]  ;;  %v919_v31 = vld [vmem:[%s1548_s3 + $0x1a0] sm:$0xf] }
  0x17   :  { %583 = vmatpush.bf16.msrb.mxu3 %v944_v1  ;;  %v1026_v32 = vld [vmem:[%s1548_s3 + $0x1a4] sm:$0xf0]  ;;  %v783_v33 = vld [vmem:[%s1548_s3 + $0x90] sm:$0xf]  ;;  %v992_v34 = vld [vmem:[%s1548_s3 + $0x94] sm:$0xf0]  ;;  %v856_v35 = vor.u32 %v1010_v28, %v855_v27  ;;  %v720_v37 = vor.u32 %v976_v30, %v719_v26 }
  0x18   :  { %545 = vmatpush.bf16.msrb.mxu0 %v744_v0  ;;  %v711_v36 = vld [vmem:[%s1548_s3] sm:$0xf]  ;;  %v920_v38 = vor.u32 %v1026_v32, %v919_v31  ;;  %v974_v39 = vld [vmem:[%s1548_s3 + $0x4] sm:$0xf0]  ;;  %v847_v40 = vld [vmem:[%s1548_s3 + $0x110] sm:$0xf]  ;;  %v784_v42 = vor.u32 %v992_v34, %v783_v33 }
  0x19   :  { %558 = vmatpush.bf16.msrb.mxu1 %v808_v5  ;;  %v1008_v41 = vld [vmem:[%s1548_s3 + $0x114] sm:$0xf0]  ;;  %v775_v43 = vld [vmem:[%s1548_s3 + $0x80] sm:$0xf]  ;;  %v911_v44 = vld [vmem:[%s1548_s3 + $0x190] sm:$0xf]  ;;  %v712_v52 = vor.u32 %v974_v39, %v711_v36 }
  0x1a   :  { %571 = vmatpush.bf16.msrb.mxu2 %v872_v11  ;;  %v1024_v45 = vld [vmem:[%s1548_s3 + $0x194] sm:$0xf0]  ;;  %v990_v46 = vld [vmem:[%s1548_s3 + $0x84] sm:$0xf0]  ;;  %v987_v47 = vld [vmem:[%s1548_s3 + $0x74] sm:$0xf]  ;;  %v848_v51 = vor.u32 %v1008_v41, %v847_v40 }
  0x1b   :  { %584 = vmatpush.bf16.msrb.mxu3 %v936_v13  ;;  %v769_v48 = vld [vmem:[%s1548_s3 + $0x78] sm:$0xf0]  ;;  %v1003_v49 = vld [vmem:[%s1548_s3 + $0xf4] sm:$0xf]  ;;  %v912_v53 = vor.u32 %v1024_v45, %v911_v44  ;;  %v776_v54 = vor.u32 %v990_v46, %v775_v43  ;;  %v985_v57 = vld [vmem:[%s1548_s3 + $0x64] sm:$0xf] }
  0x1c   :  { %546 = vmatpush.bf16.msrb.mxu0 %v736_v12  ;;  %v833_v50 = vld [vmem:[%s1548_s3 + $0xf8] sm:$0xf0]  ;;  %v772_v55 = vor.u32 %v987_v47, %v769_v48  ;;  %v761_v58 = vld [vmem:[%s1548_s3 + $0x68] sm:$0xf0]  ;;  %v1001_v59 = vld [vmem:[%s1548_s3 + $0xe4] sm:$0xf] }
  0x1d   :  { %559 = vmatpush.bf16.msrb.mxu1 %v800_v17  ;;  %v836_v56 = vor.u32 %v1003_v49, %v833_v50  ;;  %v764_v60 = vor.u32 %v985_v57, %v761_v58  ;;  %v825_v61 = vld [vmem:[%s1548_s3 + $0xe8] sm:$0xf0]  ;;  %v839_v62 = vld [vmem:[%s1548_s3 + $0x100] sm:$0xf]  ;;  %v1006_v0 = vld [vmem:[%s1548_s3 + $0x104] sm:$0xf0] }
  0x1e   :  { %572 = vmatpush.bf16.msrb.mxu2 %v864_v23  ;;  %v828_v63 = vor.u32 %v1001_v59, %v825_v61  ;;  %v903_v1 = vld [vmem:[%s1548_s3 + $0x180] sm:$0xf]  ;;  %v1022_v2 = vld [vmem:[%s1548_s3 + $0x184] sm:$0xf0]  ;;  %v840_v3 = vor.u32 %v1006_v0, %v839_v62  ;;  %v1019_v5 = vld [vmem:[%s1548_s3 + $0x174] sm:$0xf] }
  0x1f   :  { %585 = vmatpush.bf16.msrb.mxu3 %v928_v25  ;;  %v904_v4 = vor.u32 %v1022_v2, %v903_v1  ;;  %v897_v6 = vld [vmem:[%s1548_s3 + $0x178] sm:$0xf0]  ;;  %v1035_v7 = vld [vmem:[%s1548_s3 + $0x1f4] sm:$0xf]  ;;  %v1017_v17 = vld [vmem:[%s1548_s3 + $0x164] sm:$0xf] }
  0x20   :  { %547 = vmatpush.bf16.msrb.mxu0 %v728_v24  ;;  %v900_v8 = vor.u32 %v1019_v5, %v897_v6  ;;  %v961_v9 = vld [vmem:[%s1548_s3 + $0x1f8] sm:$0xf0]  ;;  %v983_v10 = vld [vmem:[%s1548_s3 + $0x54] sm:$0xf]  ;;  %v889_v18 = vld [vmem:[%s1548_s3 + $0x168] sm:$0xf0] }
  0x21   :  { %560 = vmatpush.bf16.msrb.mxu1 %v792_v29  ;;  %v753_v11 = vld [vmem:[%s1548_s3 + $0x58] sm:$0xf0]  ;;  %v964_v12 = vor.u32 %v1035_v7, %v961_v9  ;;  %v999_v14 = vld [vmem:[%s1548_s3 + $0xd4] sm:$0xf]  ;;  %v1033_v19 = vld [vmem:[%s1548_s3 + $0x1e4] sm:$0xf]  ;;  %v892_v20 = vor.u32 %v1017_v17, %v889_v18 }
  0x22   :  { %573 = vmatpush.bf16.msrb.mxu2 %v856_v35  ;;  %v756_v13 = vor.u32 %v983_v10, %v753_v11  ;;  %v817_v15 = vld [vmem:[%s1548_s3 + $0xd8] sm:$0xf0]  ;;  %v953_v21 = vld [vmem:[%s1548_s3 + $0x1e8] sm:$0xf0]  ;;  %v981_v23 = vld [vmem:[%s1548_s3 + $0x44] sm:$0xf] }
  0x23   :  { %586 = vmatpush.bf16.msrb.mxu3 %v920_v38  ;;  %v820_v16 = vor.u32 %v999_v14, %v817_v15  ;;  %v956_v22 = vor.u32 %v1033_v19, %v953_v21  ;;  %v745_v24 = vld [vmem:[%s1548_s3 + $0x48] sm:$0xf0]  ;;  %v997_v25 = vld [vmem:[%s1548_s3 + $0xc4] sm:$0xf]  ;;  %v1015_v29 = vld [vmem:[%s1548_s3 + $0x154] sm:$0xf] }
  0x24   :  { %548 = vmatpush.bf16.msrb.mxu0 %v720_v37  ;;  %v748_v26 = vor.u32 %v981_v23, %v745_v24  ;;  %v809_v27 = vld [vmem:[%s1548_s3 + $0xc8] sm:$0xf0]  ;;  %v881_v30 = vld [vmem:[%s1548_s3 + $0x158] sm:$0xf0]  ;;  %v1031_v31 = vld [vmem:[%s1548_s3 + $0x1d4] sm:$0xf] }
  0x25   :  { %561 = vmatpush.bf16.msrb.mxu1 %v784_v42  ;;  %v812_v28 = vor.u32 %v997_v25, %v809_v27  ;;  %v884_v32 = vor.u32 %v1015_v29, %v881_v30  ;;  %v945_v33 = vld [vmem:[%s1548_s3 + $0x1d8] sm:$0xf0]  ;;  %v979_v35 = vld [vmem:[%s1548_s3 + $0x34] sm:$0xf]  ;;  %v1013_v41 = vld [vmem:[%s1548_s3 + $0x144] sm:$0xf] }
  0x26   :  { %574 = vmatpush.bf16.msrb.mxu2 %v848_v51  ;;  %v948_v34 = vor.u32 %v1031_v31, %v945_v33  ;;  %v737_v36 = vld [vmem:[%s1548_s3 + $0x38] sm:$0xf0]  ;;  %v995_v37 = vld [vmem:[%s1548_s3 + $0xb4] sm:$0xf]  ;;  %v873_v42 = vld [vmem:[%s1548_s3 + $0x148] sm:$0xf0] }
  0x27   :  { %587 = vmatpush.bf16.msrb.mxu3 %v912_v53  ;;  %v740_v38 = vor.u32 %v979_v35, %v737_v36  ;;  %v801_v39 = vld [vmem:[%s1548_s3 + $0xb8] sm:$0xf0]  ;;  %v1029_v43 = vld [vmem:[%s1548_s3 + $0x1c4] sm:$0xf]  ;;  %v876_v44 = vor.u32 %v1013_v41, %v873_v42  ;;  %v937_v45 = vld [vmem:[%s1548_s3 + $0x1c8] sm:$0xf0] }
  0x28   :  { %549 = vmatpush.bf16.msrb.mxu0 %v712_v52  ;;  %v804_v40 = vor.u32 %v995_v37, %v801_v39  ;;  %v940_v46 = vor.u32 %v1029_v43, %v937_v45  ;;  %v977_v47 = vld [vmem:[%s1548_s3 + $0x24] sm:$0xf]  ;;  %v729_v48 = vld [vmem:[%s1548_s3 + $0x28] sm:$0xf0]  ;;  %v1011_v53 = vld [vmem:[%s1548_s3 + $0x134] sm:$0xf] }
  0x29   :  { %562 = vmatpush.bf16.msrb.mxu1 %v776_v54  ;;  %v993_v49 = vld [vmem:[%s1548_s3 + $0xa4] sm:$0xf]  ;;  %v732_v50 = vor.u32 %v977_v47, %v729_v48  ;;  %v793_v51 = vld [vmem:[%s1548_s3 + $0xa8] sm:$0xf0]  ;;  %v865_v54 = vld [vmem:[%s1548_s3 + $0x138] sm:$0xf0] }
  0x2a   :  { %575 = vmatpush.bf16.msrb.mxu2 %v840_v3  ;;  %v796_v52 = vor.u32 %v993_v49, %v793_v51  ;;  %v929_v57 = vld [vmem:[%s1548_s3 + $0x1b8] sm:$0xf0]  ;;  %v975_v59 = vld [vmem:[%s1548_s3 + $0x14] sm:$0xf]  ;;  %v1009_v0 = vld [vmem:[%s1548_s3 + $0x124] sm:$0xf] }
  0x2b   :  { %588 = vmatpush.bf16.msrb.mxu3 %v904_v4  ;;  %v991_v61 = vld [vmem:[%s1548_s3 + $0x94] sm:$0xf]  ;;  %v857_v1 = vld [vmem:[%s1548_s3 + $0x128] sm:$0xf0]  ;;  %v1025_v4 = vld [vmem:[%s1548_s3 + $0x1a4] sm:$0xf] }
  0x2c   :  { %594 = vmatpush.bf16.msra.mxu0 %v772_v55  ;;  %v1027_v55 = vld [vmem:[%s1548_s3 + $0x1b4] sm:$0xf]  ;;  %v860_v3 = vor.u32 %v1009_v0, %v857_v1  ;;  %v921_v5 = vld [vmem:[%s1548_s3 + $0x1a8] sm:$0xf0]  ;;  %v973_v6 = vld [vmem:[%s1548_s3 + $0x4] sm:$0xf] }
  0x2d   :  { %607 = vmatpush.bf16.msra.mxu1 %v836_v56  ;;  %v868_v56 = vor.u32 %v1011_v53, %v865_v54  ;;  %v932_v58 = vor.u32 %v1027_v55, %v929_v57  ;;  %v924_v7 = vor.u32 %v1025_v4, %v921_v5  ;;  %v989_v9 = vld [vmem:[%s1548_s3 + $0x84] sm:$0xf]  ;;  %v777_v10 = vld [vmem:[%s1548_s3 + $0x88] sm:$0xf0]  ;;  %v849_v14 = vld [vmem:[%s1548_s3 + $0x118] sm:$0xf0]  ;;  %v12_v57 = vstv %s1551_s6 }
  0x2e   :  { %620 = vmatpush.bf16.msra.mxu2 %v900_v8  ;;  %v713_v8 = vld [vmem:[%s1548_s3 + $0x8] sm:$0xf0]  ;;  %v1023_v15 = vld [vmem:[%s1548_s3 + $0x194] sm:$0xf]  ;;  %v913_v17 = vld [vmem:[%s1548_s3 + $0x198] sm:$0xf0] }
  0x2f   :  { %633 = vmatpush.bf16.msra.mxu3 %v964_v12  ;;  %v716_v11 = vor.u32 %v973_v6, %v713_v8  ;;  %v780_v12 = vor.u32 %v989_v9, %v777_v10  ;;  %v916_v19 = vor.u32 %v1023_v15, %v913_v17  ;;  %v1005_v21 = vld [vmem:[%s1548_s3 + $0x104] sm:$0xf]  ;;  %v216_v53 = vld [vmem:[%s1550_s4] sm:$0x3]  ;;  %13 = vst [vmem:[#allocation2] sm:$0x1] %v12_v57 }
  0x30   :  { %595 = vmatpush.bf16.msra.mxu0 %v764_v60  ;;  %v721_v60 = vld [vmem:[%s1548_s3 + $0x18] sm:$0xf0]  ;;  %v1021_v23 = vld [vmem:[%s1548_s3 + $0x184] sm:$0xf]  ;;  %v218_v55 = vperm.slane %v216_v53, 0 }
  0x31   :  { %608 = vmatpush.bf16.msra.mxu1 %v828_v63  ;;  %v724_v62 = vor.u32 %v975_v59, %v721_v60  ;;  %v785_v63 = vld [vmem:[%s1548_s3 + $0x98] sm:$0xf0] }
  0x32   :  { %621 = vmatpush.bf16.msra.mxu2 %v892_v20  ;;  %v788_v2 = vor.u32 %v991_v61, %v785_v63  ;;  %v219_v63 = vperm.slane %v216_v53, 1 }
  0x33   :  { %634 = vmatpush.bf16.msra.mxu3 %v956_v22  ;;  %v841_v22 = vld [vmem:[%s1548_s3 + $0x108] sm:$0xf0] }
  0x34   :  { %596 = vmatpush.bf16.msra.mxu0 %v756_v13  ;;  %v1007_v13 = vld [vmem:[%s1548_s3 + $0x114] sm:$0xf]  ;;  %v844_v25 = vor.u32 %v1005_v21, %v841_v22 }
  0x35   :  { %609 = vmatpush.bf16.msra.mxu1 %v820_v16  ;;  %v38_v16 = vld [vmem:[%s1549_s2] sm:$0xf]  ;;  %v852_v18 = vor.u32 %v1007_v13, %v849_v14 }
  0x36   :  { %622 = vmatpush.bf16.msra.mxu2 %v884_v32  ;;  %v40_v20 = vperm.slane %v38_v16, 0  ;;  %v41_v24 = vperm.slane %v38_v16, 1  ;;  %v42_v32 = vperm.slane %v38_v16, 2  ;;  %v43_v33 = vperm.slane %v38_v16, 3  ;;  %v1037_v22 = vld [vmem:[#allocation2] ss:$0 sm:$0xff] }
  0x37   :  { %635 = vmatpush.bf16.msra.mxu3 %v948_v34 }
  0x38   :  { %597 = vmatpush.bf16.msra.mxu0 %v748_v26  ;;  %v905_v26 = vld [vmem:[%s1548_s3 + $0x188] sm:$0xf0] }
  0x39   :  { %610 = vmatpush.bf16.msra.mxu1 %v812_v28  ;;  %v908_v27 = vor.u32 %v1021_v23, %v905_v26 }
  0x3a   :  { %623 = vmatpush.bf16.msra.mxu2 %v876_v44 }
  0x3b   :  { %636 = vmatpush.bf16.msra.mxu3 %v940_v46 }
  0x3c   :  { %598 = vmatpush.bf16.msra.mxu0 %v740_v38 }
  0x3d   :  { %611 = vmatpush.bf16.msra.mxu1 %v804_v40 }
  0x3e   :  { %624 = vmatpush.bf16.msra.mxu2 %v868_v56 }
  0x3f   :  { %637 = vmatpush.bf16.msra.mxu3 %v932_v58 }
  0x40   :  { %599 = vmatpush.bf16.msra.mxu0 %v732_v50 }
  0x41   :  { %612 = vmatpush.bf16.msra.mxu1 %v796_v52 }
  0x42   :  { %625 = vmatpush.bf16.msra.mxu2 %v860_v3 }
  0x43   :  { %638 = vmatpush.bf16.msra.mxu3 %v924_v7 }
  0x44   :  { %600 = vmatpush.bf16.msra.mxu0 %v724_v62 }
  0x45   :  { %613 = vmatpush.bf16.msra.mxu1 %v788_v2 }
  0x46   :  { %626 = vmatpush.bf16.msra.mxu2 %v852_v18 }
  0x47   :  { %639 = vmatpush.bf16.msra.mxu3 %v916_v19 }
  0x48   :  { %601 = vmatpush.bf16.msra.mxu0 %v716_v11 }
  0x49   :  { %614 = vmatpush.bf16.msra.mxu1 %v780_v12  ;;  %v648_v12 = vld [vmem:[%s1552_s5] sm:$0x3] }
  0x4a   :  { %627 = vmatpush.bf16.msra.mxu2 %v844_v25  ;;  %v650_v14 = vperm.slane %v648_v12, 0  ;;  %v651_v15 = vperm.slane %v648_v12, 1 }
  0x4b   :  { %640 = vmatpush.bf16.msra.mxu3 %v908_v27 }
  0x88   :  { %v101_v28 = vpop.f32.mrf.mxu0 }
  0x89   :  { %v102_v29 = vadd.f32 %v101_v28, %v40_v20  ;;  %v114_v30 = vpop.f32.mrf.mxu1 }
  0x8a   :  { %v115_v31 = vadd.f32 %v114_v30, %v41_v24 }
  0x8b   :  { %1038 = vtanh.f32 %v102_v29 }
  0x8c   :  { %1040 = vtanh.f32 %v115_v31 }
  0x90   :  { %v127_v34 = vpop.f32.mrf.mxu2  ;;  %v103_v37 = vpop.f32.mrf.mxu0 }
  0x91   :  { %v128_v35 = vadd.f32 %v127_v34, %v42_v32  ;;  %v140_v36 = vpop.f32.mrf.mxu3  ;;  %v1039_v38 = vpop.eup %1038 }
  0x92   :  { %v141_v39 = vadd.f32 %v140_v36, %v43_v33  ;;  %v116_v40 = vpop.f32.mrf.mxu1  ;;  %v1041_v41 = vpop.eup %1040  ;;  %v148_v42 = vpack.c.bf16 %v1039_v38, %v1039_v38 }
  0x93   :  { %1042 = vtanh.f32 %v128_v35  ;;  %v149_v43 = vpack.c.bf16 %v1041_v41, %v1041_v41 }
  0x94   :  { %1044 = vtanh.f32 %v141_v39  ;;  %550 = vmatmul.bf16.vlgmr.msrb.gmra.mxu0 %v148_v42 }
  0x95   :  { %563 = vmatmul.bf16.vlgmr.msrb.gmra.mxu1 %v149_v43 }
  0x98   :  { %v129_v44 = vpop.f32.mrf.mxu2 }
  0x99   :  { %v1043_v45 = vpop.eup %1042  ;;  %v142_v46 = vpop.f32.mrf.mxu3 }
  0x9a   :  { %v1045_v47 = vpop.eup %1044  ;;  %v150_v48 = vpack.c.bf16 %v1043_v45, %v1043_v45 }
  0x9b   :  { %v151_v49 = vpack.c.bf16 %v1045_v47, %v1045_v47 }
  0x9c   :  { %576 = vmatmul.bf16.vlgmr.msrb.gmra.mxu2 %v150_v48 }
  0x9d   :  { %589 = vmatmul.bf16.vlgmr.msrb.gmra.mxu3 %v151_v49 }
  0xa4   :  { %602 = vmatmul.bf16.vlgmr.msra.gmra.mxu0 %v148_v42 }
  0xa5   :  { %615 = vmatmul.bf16.vlgmr.msra.gmra.mxu1 %v149_v43 }
  0xac   :  { %628 = vmatmul.bf16.vlgmr.msra.gmra.mxu2 %v150_v48 }
  0xad   :  { %641 = vmatmul.bf16.vlgmr.msra.gmra.mxu3 %v151_v49 }
 0x111   :  { %v551_v50 = vpop.f32.mrf.mxu0 }
 0x112   :  { %v564_v51 = vpop.f32.mrf.mxu1  ;;  %v552_v59 = vadd.f32 %v551_v50, %v218_v55 }
 0x114   :  { %v565_v62 = vadd.f32 %v564_v51, %v552_v59 }
 0x119   :  { %v553_v52 = vpop.f32.mrf.mxu0 }
 0x11a   :  { %v566_v54 = vpop.f32.mrf.mxu1 }
 0x11f   :  { %v577_v56 = vpop.f32.mrf.mxu2 }
 0x120   :  { %v590_v58 = vpop.f32.mrf.mxu3  ;;  %v578_v2 = vadd.f32 %v577_v56, %v565_v62 }
 0x121   :  { %v603_v60 = vpop.f32.mrf.mxu0 }
 0x122   :  { %v616_v61 = vpop.f32.mrf.mxu1  ;;  %v604_v3 = vadd.f32 %v603_v60, %v219_v63  ;;  %v591_v6 = vadd.f32 %v590_v58, %v578_v2 }
 0x124   :  { %v617_v7 = vadd.f32 %v616_v61, %v604_v3  ;;  %1046 = vtanh.f32 %v591_v6 }
 0x127   :  { %v579_v0 = vpop.f32.mrf.mxu2 }
 0x128   :  { %v592_v1 = vpop.f32.mrf.mxu3 }
 0x129   :  { %v605_v4 = vpop.f32.mrf.mxu0 }
 0x12a   :  { %v618_v5 = vpop.f32.mrf.mxu1  ;;  %v1047_v16 = vpop.eup %1046 }
 0x12b   :  { %v654_v19 = vmul.f32 %v1047_v16, %v650_v14 }
 0x12f   :  { %v629_v8 = vpop.f32.mrf.mxu2 }
 0x130   :  { %v630_v9 = vadd.f32 %v629_v8, %v617_v7  ;;  %v642_v10 = vpop.f32.mrf.mxu3 }
 0x132   :  { %v643_v11 = vadd.f32 %v642_v10, %v630_v9 }
 0x134   :  { %1048 = vtanh.f32 %v643_v11 }
 0x137   :  { %v631_v13 = vpop.f32.mrf.mxu2 }
 0x138   :  { %v644_v17 = vpop.f32.mrf.mxu3 }
 0x13a   :  { %v1049_v18 = vpop.eup %1048 }
 0x13b   :  { %v655_v20 = vmul.f32 %v1049_v18, %v651_v15 }
 0x13d   :  { %v656_v21 = vadd.f32 %v655_v20, %v654_v19 }
 0x13f   :  { %657 = vadd.xlane.f32.xlu0 %v656_v21 }
 0x1b2   :  { %v658_v23 = vpop.xlane.xlu0 %657 }
 0x1b3   :  { %v663_v24 = vadd.f32 %v1037_v22, %v658_v23 }
 0x1b5   :  { %1050 = vtanh.f32 %v663_v24 }
 0x1bb   :  { %v1051_v25 = vpop.eup %1050 }
 0x1bc   :  { %v665_v26 = vmul.f32 0.5, %v1051_v25 }
 0x1be   :  { %v666_v27 = vadd.f32 0.5, %v665_v26 }
 0x1c0   :  { %668 = vst.msk [vmem:[%s1553_s7] sm:$0xff] %vm667_vm1, %v666_v27 }

</bundles_post_ra>
